<compile_context>
chip_gen: v5e
topology: v5e:2x2
jax: 0.10.0
libtpu: 0.0.40
codegen_flags: <defaults>
</compile_context>

<pallas_src>
import functools

import jax
import jax.numpy as jnp
import numpy as np
from jax.experimental import pallas as pl
from jax.experimental.pallas import tpu as pltpu


def _round_up(x, m):
    return ((x + m - 1) // m) * m


# ----------------------------------------------------------------------------
# Kernel
# ----------------------------------------------------------------------------
def structer_kernel(wl_tile_ref, wl_eblk_ref, wl_first_ref, wl_last_ref,  # SMEM
                    comp_ref, dst_ref, ent_ref, w_ref,                    # VMEM in
                    out_ref,                                              # VMEM out
                    m_sc, l_sc, acc_sc,                                   # scratch
                    *, tile_n, tile_e, approx_recip):
    w = pl.program_id(0)              # flat work-item index (1-D work-list grid)
    tile_i = wl_tile_ref[w]           # which N-tile this item belongs to

    @pl.when(wl_first_ref[w] == 1)
    def _init():
        m_sc[...] = jnp.full_like(m_sc, -1e30)
        l_sc[...] = jnp.zeros_like(l_sc)
        acc_sc[...] = jnp.zeros_like(acc_sc)

    comp = comp_ref[...]                                        # (te, h_pad)
    ent = ent_ref[...]                                          # (tn, h_pad)
    # scores[v, e] = <ent_emb[v], comp[e]>  (f32 accumulation on the MXU);
    # for edges with dst[e] == v this is exactly e_dot_v.
    # (Checked pattern; if the lowering ever emits a per-step vxpose of comp,
    #  feed a pre-transposed (h_pad, e_pad) copy for this matmul instead.)
    scores = jax.lax.dot_general(
        ent, comp, (((1,), (1,)), ((), ())),
        preferred_element_type=jnp.float32)                     # (tn, te) f32

    # Destination-incidence mask rebuilt in-kernel from a (tn,1) iota column
    # broadcast against the (1,te) dst row — no (N,E) HBM traffic, minimal VPU.
    rows = jax.lax.broadcasted_iota(jnp.int32, (tile_n, 1), 0) + tile_i * tile_n
    eq = rows == dst_ref[...]                                   # (tn, te) bool

    # Masked online softmax (flash-attention style carry across E-blocks).
    s = jnp.where(eq, scores, jnp.float32(-1e30))
    m_prev = m_sc[...]
    m_new = jnp.maximum(m_prev, jnp.max(s, axis=-1, keepdims=True))
    rescale = jnp.exp(m_prev - m_new)
    p = jnp.where(eq, jnp.exp(s - m_new), jnp.float32(0.0))     # unnormalized
    l_sc[...] = rescale * l_sc[...] + jnp.sum(p, axis=-1, keepdims=True)
    acc_sc[...] = rescale * acc_sc[...] + jnp.dot(
        p.astype(comp.dtype), comp, preferred_element_type=jnp.float32)
    m_sc[...] = m_new

    @pl.when(wl_last_ref[w] == 1)
    def _finalize():
        l = l_sc[...]
        # Deferred normalization: one reciprocal per node instead of E divides.
        inv_l = pl.reciprocal(jnp.maximum(l, jnp.float32(1e-30)),
                              approx=approx_recip)
        # Guard: nodes with zero in-edges get exactly 0 (not acc * 1e30).
        neigh = jnp.where(l > 0.0, acc_sc[...] * inv_l, jnp.float32(0.0))
        out = jnp.dot(neigh.astype(w_ref.dtype), w_ref[...],
                      preferred_element_type=jnp.float32)
        out_ref[...] = jnp.tanh(out).astype(out_ref.dtype)


# ----------------------------------------------------------------------------
# Static per-graph preprocessing (hoist out of the training/eval step loop)
# ----------------------------------------------------------------------------
def build_graph_plan(dst, n_nodes, *, src, etype, tile_n=256, tile_e=512):
    """Host-side, graph-static plan: sort edges by dst, pre-permute src/etype,
    pad the dst row, and build the 1-D work-list of (N-tile, E-block) pairs."""
    dst_np = np.asarray(dst).astype(np.int64)
    src_np = np.asarray(src).astype(np.int32)
    ety_np = np.asarray(etype).astype(np.int32)
    E = int(dst_np.shape[0])
    N = int(n_nodes)

    order = np.argsort(dst_np, kind="stable")
    dst_sorted = dst_np[order]

    tn = min(tile_n, _round_up(N, 8))
    te = min(tile_e, _round_up(E, 128))
    n_pad = _round_up(N, tn)
    e_pad = _round_up(E, te)
    n_blk_n = n_pad // tn
    n_blk_e = e_pad // te

    # Per-N-tile inclusive range of E-blocks holding its in-edges (edges are
    # contiguous per tile after the sort, so every block in the range has work).
    row_lo = np.arange(n_blk_n, dtype=np.int64) * tn
    e_start = np.searchsorted(dst_sorted, row_lo, side="left")
    e_end = np.searchsorted(dst_sorted, row_lo + tn, side="left")
    e_last = np.maximum(e_end - 1, e_start)
    blk_lo = np.minimum(e_start // te, n_blk_e - 1)
    blk_hi = np.minimum(np.maximum(e_last // te, blk_lo), n_blk_e - 1)

    # Flat work-list: one item per (tile, e_block) with real work; empty tiles
    # still get one item so their (zero) output tile is written.
    spans = (blk_hi - blk_lo + 1).astype(np.int64)
    n_work = int(spans.sum())
    starts = np.cumsum(spans) - spans
    wl_tile = np.repeat(np.arange(n_blk_n, dtype=np.int64), spans)
    item_off = np.arange(n_work, dtype=np.int64) - np.repeat(starts, spans)
    wl_eblk = np.repeat(blk_lo, spans) + item_off
    wl_first = np.zeros(n_work, dtype=np.int32)
    wl_first[starts] = 1
    wl_last = np.zeros(n_work, dtype=np.int32)
    wl_last[np.cumsum(spans) - 1] = 1

    # Padded edges get dst = n_pad, which matches no destination row.
    dst_blocks = np.full((1, e_pad), n_pad, dtype=np.int32)
    dst_blocks[0, :E] = dst_sorted.astype(np.int32)

    return dict(
        tn=tn, te=te, n_pad=n_pad, e_pad=e_pad, n_edges=E, n_nodes=N,
        src_sorted=jnp.asarray(src_np[order]),
        etype_sorted=jnp.asarray(ety_np[order]),
        dst_blocks=jnp.asarray(dst_blocks),
        wl_tile=jnp.asarray(wl_tile.astype(np.int32)),
        wl_eblk=jnp.asarray(wl_eblk.astype(np.int32)),
        wl_first=jnp.asarray(wl_first),
        wl_last=jnp.asarray(wl_last),
    )


# ----------------------------------------------------------------------------
# Forward wrapper
# ----------------------------------------------------------------------------
def structer_layer(ent_emb, rel_emb, src, dst, etype, neigh_w, *,
                   tile_n=256, tile_e=512, compute_dtype=jnp.bfloat16,
                   out_dtype=None, plan=None):
    """StructerLayer.forward. Gathers (glue) stay in plain JAX; the edge-softmax
    aggregation + linear + tanh hot path runs in a 1-D work-list Pallas kernel."""
    N, H = ent_emb.shape
    if plan is None:
        plan = build_graph_plan(dst, N, src=src, etype=etype,
                                tile_n=tile_n, tile_e=tile_e)
    out_dtype = compute_dtype if out_dtype is None else out_dtype

    tn, te = plan["tn"], plan["te"]
    n_pad, e_pad, E = plan["n_pad"], plan["e_pad"], plan["n_edges"]
    h_pad = _round_up(H, 128)

    # Fused gather directly in sorted-edge order (no separate f32 permute),
    # cast to the MXU compute dtype before building the padded slab.
    comp = (ent_emb[plan["src_sorted"]]
            + rel_emb[plan["etype_sorted"]]).astype(compute_dtype)    # (E, H)
    comp_p = jnp.zeros((e_pad, h_pad), compute_dtype).at[:E, :H].set(comp)
    ent_p = jnp.zeros((n_pad, h_pad), compute_dtype).at[:N, :H].set(
        ent_emb.astype(compute_dtype))
    w_p = jnp.zeros((h_pad, h_pad), compute_dtype).at[:H, :H].set(
        neigh_w.astype(compute_dtype))

    kernel = functools.partial(
        structer_kernel, tile_n=tn, tile_e=te,
        approx_recip=(compute_dtype != jnp.float32))

    n_work = int(plan["wl_tile"].shape[0])
    grid_spec = pltpu.PrefetchScalarGridSpec(
        num_scalar_prefetch=4,
        grid=(n_work,),
        in_specs=[
            pl.BlockSpec((te, h_pad),    lambda w, wt, we, wf, wl: (we[w], 0)),
            pl.BlockSpec((1, te),        lambda w, wt, we, wf, wl: (0, we[w])),
            pl.BlockSpec((tn, h_pad),    lambda w, wt, we, wf, wl: (wt[w], 0)),
            pl.BlockSpec((h_pad, h_pad), lambda w, wt, we, wf, wl: (0, 0)),
        ],
        out_specs=pl.BlockSpec((tn, h_pad), lambda w, wt, we, wf, wl: (wt[w], 0)),
        scratch_shapes=[
            pltpu.VMEM((tn, 1), jnp.float32),      # running max m
            pltpu.VMEM((tn, 1), jnp.float32),      # running denom l
            pltpu.VMEM((tn, h_pad), jnp.float32),  # running numerator acc
        ],
    )

    out = pl.pallas_call(
        kernel,
        out_shape=jax.ShapeDtypeStruct((n_pad, h_pad), out_dtype),
        grid_spec=grid_spec,
        compiler_params=pltpu.CompilerParams(
            dimension_semantics=("arbitrary",)),
    )(plan["wl_tile"], plan["wl_eblk"], plan["wl_first"], plan["wl_last"],
      comp_p, plan["dst_blocks"], ent_p, w_p)

    return out[:N, :H]


# ----------------------------------------------------------------------------
# Pure-JAX reference (mirrors the DGL message passing)
# ----------------------------------------------------------------------------
def reference_forward(ent_emb, rel_emb, src, dst, etype, neigh_w, n_nodes):
    comp = ent_emb[src] + rel_emb[etype]                     # u_add_e
    score = jnp.sum(comp * ent_emb[dst], axis=-1)            # e_dot_v
    seg_max = jax.ops.segment_max(score, dst, num_segments=n_nodes)
    ex = jnp.exp(score - seg_max[dst])
    seg_sum = jax.ops.segment_sum(ex, dst, num_segments=n_nodes)
    alpha = ex / seg_sum[dst]                                # edge_softmax
    neigh = jax.ops.segment_sum(comp * alpha[:, None], dst, num_segments=n_nodes)
    return jnp.tanh(neigh @ neigh_w)


def _make_inputs(key, n_ent, h_dim, n_rel, n_edges, random_dst):
    k_ent, k_rel, k_src, k_dst, k_ety, k_w = jax.random.split(key, 6)
    ent_emb = jax.random.normal(k_ent, (n_ent, h_dim), jnp.float32)
    rel_emb = jax.random.normal(k_rel, (2 * n_rel, h_dim), jnp.float32)
    if random_dst:
        dst = jax.random.randint(k_dst, (n_edges,), 0, n_ent, dtype=jnp.int32)
    else:
        dst = jnp.tile(jnp.arange(n_ent, dtype=jnp.int32), n_edges // n_ent)
    src = jax.random.randint(k_src, (n_edges,), 0, n_ent, dtype=jnp.int32)
    etype = jax.random.randint(k_ety, (n_edges,), 0, 2 * n_rel, dtype=jnp.int32)
    # get_param(h_dim, h_dim): xavier-uniform style deterministic init
    limit = float(np.sqrt(6.0 / (h_dim + h_dim)))
    neigh_w = jax.random.uniform(k_w, (h_dim, h_dim), jnp.float32, -limit, limit)
    return ent_emb, rel_emb, src, dst, etype, neigh_w


if __name__ == "__main__":
    key = jax.random.PRNGKey(0)
    k1, k2 = jax.random.split(key)

    # Case 1: small graph consistent with the module (every node has 4 in-edges).
    n_ent, h_dim, n_rel = 16, 32, 5
    inputs = _make_inputs(k1, n_ent, h_dim, n_rel, 4 * n_ent, random_dst=False)
    ent_emb, rel_emb, src, dst, etype, neigh_w = inputs
    ref = reference_forward(*inputs, n_ent)

    # Static graph plan built once and reused across calls (hoisted preprocessing).
    plan1 = build_graph_plan(dst, n_ent, src=src, etype=etype)

    # Exact-dtype path: proves the work-list / online-softmax kernel matches the
    # original module semantics.
    out_f32 = structer_layer(*inputs, compute_dtype=jnp.float32, plan=plan1)
    out_f32 = jax.block_until_ready(out_f32)
    np.testing.assert_allclose(np.asarray(out_f32), np.asarray(ref),
                               rtol=1e-4, atol=1e-4)

    # Default fast path (bf16 MXU operands + bf16 output, f32 accumulation):
    # loose sanity bound only — precision, not semantics, differs from f32 ref.
    out_fast = structer_layer(*inputs, plan=plan1)
    out_fast = jax.block_until_ready(out_fast)
    assert bool(jnp.all(jnp.isfinite(out_fast)))
    np.testing.assert_allclose(np.asarray(out_fast.astype(jnp.float32)),
                               np.asarray(ref), rtol=0.1, atol=0.15)

    # Case 2: multiple N-tiles and multi-E-block tiles with random dst —
    # exercises the online-softmax carry across work items, the is_first /
    # is_last gating, and output-tile transitions in the 1-D work-list grid.
    n_ent2, h_dim2, n_rel2, n_edges2 = 24, 32, 7, 640
    inputs2 = _make_inputs(k2, n_ent2, h_dim2, n_rel2, n_edges2, random_dst=True)
    ref2 = reference_forward(*inputs2, n_ent2)
    out2 = structer_layer(*inputs2, tile_n=8, tile_e=128,
                          compute_dtype=jnp.float32)
    out2 = jax.block_until_ready(out2)
    np.testing.assert_allclose(np.asarray(out2), np.asarray(ref2),
                               rtol=1e-4, atol=1e-4)

    print("KERNEL_OK")
</pallas_src>

<mosaic_0001>
module attributes {stable_mosaic.version = 11 : i64} {
  func.func @structer_kernel(%arg0: i32, %arg1: memref<1xi32, #tpu.memory_space<smem>>, %arg2: memref<1xi32, #tpu.memory_space<smem>>, %arg3: memref<1xi32, #tpu.memory_space<smem>>, %arg4: memref<1xi32, #tpu.memory_space<smem>>, %arg5: memref<128x128xf32, #tpu.memory_space<vmem>>, %arg6: memref<1x128xi32, #tpu.memory_space<vmem>>, %arg7: memref<16x128xf32, #tpu.memory_space<vmem>>, %arg8: memref<128x128xf32, #tpu.memory_space<vmem>>, %arg9: memref<16x128xf32, #tpu.memory_space<vmem>>, %arg10: memref<16x1xf32, #tpu.memory_space<vmem>>, %arg11: memref<16x1xf32, #tpu.memory_space<vmem>>, %arg12: memref<16x128xf32, #tpu.memory_space<vmem>>) attributes {dimension_semantics = [#tpu.dimension_semantics<arbitrary>], iteration_bounds = array<i64: 1>, scalar_prefetch = 4 : i64, scratch_operands = 3 : i64, tpu.core_type = #tpu.core_type<tc>, window_params = [{transform_indices = @transform_0, window_bounds = array<i64: 128, 128>}, {transform_indices = @transform_1, window_bounds = array<i64: 1, 128>}, {transform_indices = @transform_2, window_bounds = array<i64: 16, 128>}, {pipeline_mode = #tpu.pipeline_mode<synchronous>, transform_indices = @transform_3, window_bounds = array<i64: 128, 128>}, {transform_indices = @transform_4, window_bounds = array<i64: 16, 128>}]} {
    %0 = arith.index_cast %arg0 : i32 to index
    %1 = memref.load %arg1[%0] : memref<1xi32, #tpu.memory_space<smem>>
    %2 = arith.index_cast %arg0 : i32 to index
    %3 = memref.load %arg3[%2] : memref<1xi32, #tpu.memory_space<smem>>
    %c1_i32 = arith.constant 1 : i32
    %4 = arith.cmpi eq, %3, %c1_i32 : i32
    %5 = arith.extui %4 : i1 to i32
    %c0_i32 = arith.constant 0 : i32
    %6 = arith.cmpi ne, %5, %c0_i32 : i32
    scf.if %6 {
      %cst_24 = arith.constant -1.000000e+30 : f32
      %49 = vector.broadcast %cst_24 : f32 to vector<16x1xf32>
      %c0_25 = arith.constant 0 : index
      %c0_26 = arith.constant 0 : index
      %50 = vector.load %arg10[%c0_25, %c0_26] : memref<16x1xf32, #tpu.memory_space<vmem>>, vector<16x1xf32>
      tpu.vector_store %arg10[%c0_25, %c0_26], %49 {strides = array<i32>} : memref<16x1xf32, #tpu.memory_space<vmem>>, vector<16x1xf32>,
      %cst_27 = arith.constant 0.000000e+00 : f32
      %51 = vector.broadcast %cst_27 : f32 to vector<16x1xf32>
      %c0_28 = arith.constant 0 : index
      %c0_29 = arith.constant 0 : index
      %52 = vector.load %arg11[%c0_28, %c0_29] : memref<16x1xf32, #tpu.memory_space<vmem>>, vector<16x1xf32>
      tpu.vector_store %arg11[%c0_28, %c0_29], %51 {strides = array<i32>} : memref<16x1xf32, #tpu.memory_space<vmem>>, vector<16x1xf32>,
      %cst_30 = arith.constant 0.000000e+00 : f32
      %53 = vector.broadcast %cst_30 : f32 to vector<16x128xf32>
      %c0_31 = arith.constant 0 : index
      %c0_32 = arith.constant 0 : index
      %54 = vector.load %arg12[%c0_31, %c0_32] : memref<16x128xf32, #tpu.memory_space<vmem>>, vector<16x128xf32>
      tpu.vector_store %arg12[%c0_31, %c0_32], %53 {strides = array<i32>} : memref<16x128xf32, #tpu.memory_space<vmem>>, vector<16x128xf32>,
    } else {
    }
    %c0 = arith.constant 0 : index
    %c0_0 = arith.constant 0 : index
    %7 = vector.load %arg5[%c0, %c0_0] : memref<128x128xf32, #tpu.memory_space<vmem>>, vector<128x128xf32>
    %c0_1 = arith.constant 0 : index
    %c0_2 = arith.constant 0 : index
    %8 = vector.load %arg7[%c0_1, %c0_2] : memref<16x128xf32, #tpu.memory_space<vmem>>, vector<16x128xf32>
    %cst = arith.constant dense<0.000000e+00> : vector<16x128xf32>
    %9 = tpu.matmul %8, %7, %cst {dimension_numbers = #tpu.dot_dimension_numbers<[1], [1], [0], [0], [0, 0, 1, 0], [], []>} : vector<16x128xf32>, vector<128x128xf32>, vector<16x128xf32> -> vector<16x128xf32>
    %10 = tpu.iota {dimensions = array<i32: 0>} : vector<16x1xi32>
    %c16_i32 = arith.constant 16 : i32
    %11 = arith.muli %1, %c16_i32 : i32
    %12 = vector.broadcast %11 : i32 to vector<16x1xi32>
    %13 = arith.addi %10, %12 : vector<16x1xi32>
    %c0_3 = arith.constant 0 : index
    %c0_4 = arith.constant 0 : index
    %14 = vector.load %arg6[%c0_3, %c0_4] : memref<1x128xi32, #tpu.memory_space<vmem>>, vector<1x128xi32>
    %15 = vector.broadcast %13 : vector<16x1xi32> to vector<16x128xi32>
    %16 = vector.broadcast %14 : vector<1x128xi32> to vector<16x128xi32>
    %17 = arith.cmpi eq, %15, %16 : vector<16x128xi32>
    %cst_5 = arith.constant -1.000000e+30 : f32
    %18 = vector.broadcast %cst_5 : f32 to vector<16x128xf32>
    %19 = arith.select %17, %9, %18 : vector<16x128xi1>, vector<16x128xf32>
    %c0_6 = arith.constant 0 : index
    %c0_7 = arith.constant 0 : index
    %20 = vector.load %arg10[%c0_6, %c0_7] : memref<16x1xf32, #tpu.memory_space<vmem>>, vector<16x1xf32>
    %cst_8 = arith.constant dense<0xFF800000> : vector<16xf32>
    %21 = vector.multi_reduction <maximumf>, %19, %cst_8 [1] : vector<16x128xf32> to vector<16xf32>
    %22 = vector.shape_cast %21 : vector<16xf32> to vector<16x1xf32>
    %23 = arith.maximumf %20, %22 : vector<16x1xf32>
    %24 = arith.subf %20, %23 : vector<16x1xf32>
    %25 = math.exp %24 : vector<16x1xf32>
    %26 = vector.broadcast %23 : vector<16x1xf32> to vector<16x128xf32>
    %27 = arith.subf %19, %26 : vector<16x128xf32>
    %28 = math.exp %27 : vector<16x128xf32>
    %cst_9 = arith.constant 0.000000e+00 : f32
    %29 = vector.broadcast %cst_9 : f32 to vector<16x128xf32>
    %30 = arith.select %17, %28, %29 : vector<16x128xi1>, vector<16x128xf32>
    %c0_10 = arith.constant 0 : index
    %c0_11 = arith.constant 0 : index
    %31 = vector.load %arg11[%c0_10, %c0_11] : memref<16x1xf32, #tpu.memory_space<vmem>>, vector<16x1xf32>
    %32 = arith.mulf %25, %31 : vector<16x1xf32>
    %cst_12 = arith.constant dense<0.000000e+00> : vector<16xf32>
    %33 = vector.multi_reduction <add>, %30, %cst_12 [1] : vector<16x128xf32> to vector<16xf32>
    %34 = vector.shape_cast %33 : vector<16xf32> to vector<16x1xf32>
    %35 = arith.addf %32, %34 : vector<16x1xf32>
    %c0_13 = arith.constant 0 : index
    %c0_14 = arith.constant 0 : index
    %36 = vector.load %arg11[%c0_13, %c0_14] : memref<16x1xf32, #tpu.memory_space<vmem>>, vector<16x1xf32>
    tpu.vector_store %arg11[%c0_13, %c0_14], %35 {strides = array<i32>} : memref<16x1xf32, #tpu.memory_space<vmem>>, vector<16x1xf32>,
    %c0_15 = arith.constant 0 : index
    %c0_16 = arith.constant 0 : index
    %37 = vector.load %arg12[%c0_15, %c0_16] : memref<16x128xf32, #tpu.memory_space<vmem>>, vector<16x128xf32>
    %38 = vector.broadcast %25 : vector<16x1xf32> to vector<16x128xf32>
    %39 = arith.mulf %38, %37 : vector<16x128xf32>
    %cst_17 = arith.constant dense<0.000000e+00> : vector<16x128xf32>
    %40 = tpu.matmul %30, %7, %cst_17 {dimension_numbers = #tpu.dot_dimension_numbers<[1], [0], [0], [1], [0, 0, 1, 1], [], []>} : vector<16x128xf32>, vector<128x128xf32>, vector<16x128xf32> -> vector<16x128xf32>
    %41 = arith.addf %39, %40 : vector<16x128xf32>
    %c0_18 = arith.constant 0 : index
    %c0_19 = arith.constant 0 : index
    %42 = vector.load %arg12[%c0_18, %c0_19] : memref<16x128xf32, #tpu.memory_space<vmem>>, vector<16x128xf32>
    tpu.vector_store %arg12[%c0_18, %c0_19], %41 {strides = array<i32>} : memref<16x128xf32, #tpu.memory_space<vmem>>, vector<16x128xf32>,
    %c0_20 = arith.constant 0 : index
    %c0_21 = arith.constant 0 : index
    %43 = vector.load %arg10[%c0_20, %c0_21] : memref<16x1xf32, #tpu.memory_space<vmem>>, vector<16x1xf32>
    tpu.vector_store %arg10[%c0_20, %c0_21], %23 {strides = array<i32>} : memref<16x1xf32, #tpu.memory_space<vmem>>, vector<16x1xf32>,
    %44 = arith.index_cast %arg0 : i32 to index
    %45 = memref.load %arg4[%44] : memref<1xi32, #tpu.memory_space<smem>>
    %c1_i32_22 = arith.constant 1 : i32
    %46 = arith.cmpi eq, %45, %c1_i32_22 : i32
    %47 = arith.extui %46 : i1 to i32
    %c0_i32_23 = arith.constant 0 : i32
    %48 = arith.cmpi ne, %47, %c0_i32_23 : i32
    scf.if %48 {
      %c0_24 = arith.constant 0 : index
      %c0_25 = arith.constant 0 : index
      %49 = vector.load %arg11[%c0_24, %c0_25] : memref<16x1xf32, #tpu.memory_space<vmem>>, vector<16x1xf32>
      %cst_26 = arith.constant 1.000000e-30 : f32
      %50 = vector.broadcast %cst_26 : f32 to vector<16x1xf32>
      %51 = arith.maximumf %49, %50 : vector<16x1xf32>
      %52 = tpu.reciprocal %51 : vector<16x1xf32> -> vector<16x1xf32>
      %cst_27 = arith.constant 0.000000e+00 : f32
      %53 = vector.broadcast %cst_27 : f32 to vector<16x1xf32>
      %54 = arith.cmpf ogt, %49, %53 : vector<16x1xf32>
      %c0_28 = arith.constant 0 : index
      %c0_29 = arith.constant 0 : index
      %55 = vector.load %arg12[%c0_28, %c0_29] : memref<16x128xf32, #tpu.memory_space<vmem>>, vector<16x128xf32>
      %56 = vector.broadcast %52 : vector<16x1xf32> to vector<16x128xf32>
      %57 = arith.mulf %55, %56 : vector<16x128xf32>
      %cst_30 = arith.constant 0.000000e+00 : f32
      %58 = vector.shape_cast %54 : vector<16x1xi1> to vector<16x1xi1>
      %59 = vector.broadcast %58 : vector<16x1xi1> to vector<16x128xi1>
      %60 = vector.broadcast %cst_30 : f32 to vector<16x128xf32>
      %61 = arith.select %59, %57, %60 : vector<16x128xi1>, vector<16x128xf32>
      %c0_31 = arith.constant 0 : index
      %c0_32 = arith.constant 0 : index
      %62 = vector.load %arg8[%c0_31, %c0_32] : memref<128x128xf32, #tpu.memory_space<vmem>>, vector<128x128xf32>
      %cst_33 = arith.constant dense<0.000000e+00> : vector<16x128xf32>
      %63 = tpu.matmul %61, %62, %cst_33 {dimension_numbers = #tpu.dot_dimension_numbers<[1], [0], [0], [1], [0, 0, 1, 1], [], []>} : vector<16x128xf32>, vector<128x128xf32>, vector<16x128xf32> -> vector<16x128xf32>
      %64 = math.tanh %63 : vector<16x128xf32>
      %c0_34 = arith.constant 0 : index
      %c0_35 = arith.constant 0 : index
      %65 = vector.load %arg9[%c0_34, %c0_35] : memref<16x128xf32, #tpu.memory_space<vmem>>, vector<16x128xf32>
      tpu.vector_store %arg9[%c0_34, %c0_35], %64 {strides = array<i32>} : memref<16x128xf32, #tpu.memory_space<vmem>>, vector<16x128xf32>,
    } else {
    }
    return
  }
  func.func @transform_0(%arg0: i32, %arg1: memref<1xi32, #tpu.memory_space<smem>>, %arg2: memref<1xi32, #tpu.memory_space<smem>>, %arg3: memref<1xi32, #tpu.memory_space<smem>>, %arg4: memref<1xi32, #tpu.memory_space<smem>>) -> (i32, i32) {
    %0 = arith.index_cast %arg0 : i32 to index
    %1 = memref.load %arg2[%0] : memref<1xi32, #tpu.memory_space<smem>>
    %c0_i32 = arith.constant 0 : i32
    %c0_i32_0 = arith.constant 0 : i32
    return %1, %c0_i32 : i32, i32
  }
  func.func @transform_1(%arg0: i32, %arg1: memref<1xi32, #tpu.memory_space<smem>>, %arg2: memref<1xi32, #tpu.memory_space<smem>>, %arg3: memref<1xi32, #tpu.memory_space<smem>>, %arg4: memref<1xi32, #tpu.memory_space<smem>>) -> (i32, i32) {
    %0 = arith.index_cast %arg0 : i32 to index
    %1 = memref.load %arg2[%0] : memref<1xi32, #tpu.memory_space<smem>>
    %c0_i32 = arith.constant 0 : i32
    %c0_i32_0 = arith.constant 0 : i32
    return %c0_i32, %1 : i32, i32
  }
  func.func @transform_2(%arg0: i32, %arg1: memref<1xi32, #tpu.memory_space<smem>>, %arg2: memref<1xi32, #tpu.memory_space<smem>>, %arg3: memref<1xi32, #tpu.memory_space<smem>>, %arg4: memref<1xi32, #tpu.memory_space<smem>>) -> (i32, i32) {
    %0 = arith.index_cast %arg0 : i32 to index
    %1 = memref.load %arg1[%0] : memref<1xi32, #tpu.memory_space<smem>>
    %c0_i32 = arith.constant 0 : i32
    %c0_i32_0 = arith.constant 0 : i32
    return %1, %c0_i32 : i32, i32
  }
  func.func @transform_3(%arg0: i32, %arg1: memref<1xi32, #tpu.memory_space<smem>>, %arg2: memref<1xi32, #tpu.memory_space<smem>>, %arg3: memref<1xi32, #tpu.memory_space<smem>>, %arg4: memref<1xi32, #tpu.memory_space<smem>>) -> (i32, i32) {
    %c0_i32 = arith.constant 0 : i32
    %c0_i32_0 = arith.constant 0 : i32
    %c0_i32_1 = arith.constant 0 : i32
    return %c0_i32, %c0_i32_0 : i32, i32
  }
  func.func @transform_4(%arg0: i32, %arg1: memref<1xi32, #tpu.memory_space<smem>>, %arg2: memref<1xi32, #tpu.memory_space<smem>>, %arg3: memref<1xi32, #tpu.memory_space<smem>>, %arg4: memref<1xi32, #tpu.memory_space<smem>>) -> (i32, i32) {
    %0 = arith.index_cast %arg0 : i32 to index
    %1 = memref.load %arg1[%0] : memref<1xi32, #tpu.memory_space<smem>>
    %c0_i32 = arith.constant 0 : i32
    %c0_i32_0 = arith.constant 0 : i32
    return %1, %c0_i32 : i32, i32
  }
}

</mosaic_0001>

<bundles_post_ra>
// kernel: tpu_custom_call.1
= control target key start
LH: loop header
LB: loop body
LE: loop exit
PB: predicated region body
PF: predicated region fallthrough
CT: control target
= control target key end

     0   :  { %s751_s0 = inlined_call_operand.<no memory space> [shape: s32[1], index: 0, kind: input, shape index: {}]   ;;  %s752_s1 = inlined_call_operand.<no memory space> [shape: s32[1], index: 1, kind: input, shape index: {}]   ;;  %s753_s2 = inlined_call_operand.<no memory space> [shape: s32[1], index: 2, kind: input, shape index: {}]   ;;  %s754_s3 = inlined_call_operand.<no memory space> [shape: s32[1], index: 3, kind: input, shape index: {}]   ;;  %s755_s4 = inlined_call_operand.hbm [shape: f32[128,128], index: 4, kind: input, shape index: {}]   ;;  %s756_s5 = inlined_call_operand.vmem [shape: s32[1,128], index: 5, kind: input, shape index: {}]   ;;  %s757_s6 = inlined_call_operand.hbm [shape: f32[16,128], index: 6, kind: input, shape index: {}]   ;;  %s758_s7 = inlined_call_operand.hbm [shape: f32[128,128], index: 7, kind: input, shape index: {}]   ;;  %s759_s8 = inlined_call_operand.hbm [shape: f32[16,128], index: 8, kind: output, shape index: {}]  }
   0x1   :  { %13 = sst [smem:[#allocation6]] %s751_s0 }
   0x2   :  { %16 = sst [smem:[#allocation9]] %s754_s3 }
   0x3   :  { %17 = vsyncpa [#allocation11], 0 }
   0x4   :  { %18 = vsyncpa [#allocation14], 0 }
   0x5   :  { %19 = vsyncpa [#allocation12], 0  ;;  %s46_s9 = sld [smem:[#allocation6]]  ;;  %s579_s10 = smov [#allocation13]  }
   0x6   :  { %s640_s11 = sshll.u32 %s579_s10, 4  ;;  %s410_s14 = sshll.u32 %s752_s1, 7  ;;  %s55_s11 = int_to_ptr.vmem [resolvable:$true] %s640_s11 }
   0x7   :  { %s27_s0 = scalar_lea.hbm %s755_s4, %s410_s14  ;;  %s580_s3 = smov [#allocation10]  }
   0x8   :  { %s28_s17 = sshll.u32 %s27_s0, 4  ;;  %s651_s18 = sshll.u32 %s580_s3, 4  ;;  %s649_s17 = int_to_ptr.hbm [resolvable:$true] %s28_s17  ;;  %s31_s18 = int_to_ptr.vmem [resolvable:$true] %s651_s18 }
   0x9   :  { %s65_s21 = sshll.u32 %s758_s7, 4  ;;  %s581_s27 = smov [#allocation15]   ;;  %s657_s21 = int_to_ptr.hbm [resolvable:$true] %s65_s21 }
   0xa   :  { %s662_s28 = sshll.u32 %s581_s27, 4  ;;  %s68_s28 = int_to_ptr.vmem [resolvable:$true] %s662_s28 }
   0xb   :  { %s411_s22 = sshll.u32 %s46_s9, 4  ;;  %s481_s9 = scalar_lea.hbm %s757_s6, 16 }
   0xc   :  { %s51_s25 = scalar_lea.hbm %s757_s6, %s411_s22 }
   0xd   :  { %s52_s26 = sshll.u32 %s51_s25, 4  ;;  %s53_s26 = int_to_ptr.hbm [resolvable:$true] %s52_s26 }
   0xe   :  { %s477_s29 = sshra.s32 %s53_s26, 4  ;;  %s478_s29 = int_to_ptr.hbm [resolvable:$true] %s477_s29 }
   0xf   :  { %s479_s30 = scalar_lea.hbm %s478_s29, 16  ;;  %p482_p1 = scmp.lt.s32.totalorder %s478_s29, %s757_s6 }
  0x10   :  { %p480_p0 = scmp.ne.s32.totalorder %s478_s29, %s479_s30  ;;  %p483_p2 = scmp.lt.s32.totalorder %s481_s9, %s479_s30 }
  0x12   :  { %p484_p3 = por %p483_p2, %p482_p1 }
  0x14   :  { %p485_p4 = pnand %p484_p3, %p480_p0 }
  0x16   :  { %488 = shalt.err (!%p485_p4)
}
  0x17   :  { %s582_s14 = smov 128   ;;  %s583_s15 = smov 8  }
  0x18   :  { %60 = dma.hbm_to_vmem [thread:$0]  %s53_s26, 256, %s55_s11, [#allocation14], %s582_s14, %s582_s14, %s583_s15  }
  0x19   :  { %s501_s16 = sshra.s32 %s649_s17, 4  ;;  %s505_s6 = scalar_lea.hbm %s755_s4, 128  ;;  %s502_s16 = int_to_ptr.hbm [resolvable:$true] %s501_s16 }
  0x1a   :  { %s503_s0 = scalar_lea.hbm %s502_s16, 128  ;;  %p506_p6 = scmp.lt.s32.totalorder %s502_s16, %s755_s4 }
  0x1b   :  { %p504_p5 = scmp.ne.s32.totalorder %s502_s16, %s503_s0  ;;  %p507_p7 = scmp.lt.s32.totalorder %s505_s6, %s503_s0 }
  0x1d   :  { %p508_p8 = por %p507_p7, %p506_p6 }
  0x1f   :  { %p509_p9 = pnand %p508_p8, %p504_p5 }
  0x21   :  { %512 = shalt.err (!%p509_p9)
}
  0x22   :  { %36 = dma.hbm_to_vmem [thread:$0]  %s649_s17, 2048, %s31_s18, [#allocation11], %s582_s14, %s582_s14, %s583_s15  }
  0x23   :  { %73 = dma.hbm_to_vmem [thread:$0]  %s657_s21, 2048, %s68_s28, [#allocation14], %s582_s14, %s582_s14, %s583_s15  }
  0x24   :  { %573 = dma.done.wait [#allocation11], 2048  }
  0x25   :  { %574 = vsyncadd [#allocation11], 4294965248 }
  0x26   :  { %575 = dma.done.wait [#allocation14], 2304  }
  0x27   :  { %576 = vsyncadd [#allocation14], 4294964992  ;;  %p93_p10 = scmp.lt.s32.totalorder %s752_s1, 0  ;;  %s696_s23 = sld [smem:[#allocation6]] }
  0x28   :  { %p401_p11 = scmp.ne.s32.totalorder %s753_s2, 1 }
  0x29   :  { %s763_s1 = smov (!%p93_p10, %s752_s1), 0 }
  0x2a   :  { %s95_s21 = scalar_lea.vmem %s756_s5, %s763_s1  ;;  %106 = sbr.rel (%p401_p11) target bundleno = 54 (0x36), region = 33 }
  0x2f   :  { %vm107_vm0 = vcmask 7168   ;;  %v584_v0 = vmov -1e+30   ;;  %v585_v1 = vmov 0.0  }
  0x30   :  { %108 = vst.msk [vmem:[#allocation2] sm:$0xff] %vm107_vm0, %v584_v0 }
  0x31   :  { %109 = vst.msk [vmem:[#allocation2 + $0x8] sm:$0xff] %vm107_vm0, %v584_v0 }
  0x32   :  { %110 = vst.msk [vmem:[#allocation3] sm:$0xff] %vm107_vm0, %v585_v1 }
  0x33   :  { %111 = vst.msk [vmem:[#allocation3 + $0x8] sm:$0xff] %vm107_vm0, %v585_v1 }
  0x34   :  { %112 = vst [vmem:[#allocation4] sm:$0xff] %v585_v1 }
  0x35   :  { %113 = vst [vmem:[#allocation4 + $0x8] sm:$0xff] %v585_v1 }
  0x36 PF:  { %v129_v2 = vld [vmem:[#allocation10 + $0x78] sm:$0xff]  ;;  %v128_v3 = vld [vmem:[#allocation10 + $0x70] sm:$0xff]  ;;  %v127_v4 = vld [vmem:[#allocation10 + $0x68] sm:$0xff]  ;;  %v155_v20 = vlaneseq  ;;  %s402_s2 = sshll.u32 %s696_s23, 4  ;;  %v586_v31 = vmov 0   ;;  %vm210_vm3 = vcmask 7168  }
  0x37   :  { %132 = vmatpush.xpose.msra.mxu0 %v129_v2  ;;  %413 = vmatpush.xpose.msra.mxu2 %v129_v2  ;;  %v126_v5 = vld [vmem:[#allocation10 + $0x60] sm:$0xff]  ;;  %v125_v6 = vld [vmem:[#allocation10 + $0x58] sm:$0xff]  ;;  %v124_v7 = vld [vmem:[#allocation10 + $0x50] sm:$0xff]  ;;  %v159_v22 = vstv %s402_s2  ;;  %s256_s1 = sld [smem:[#allocation9]] }
  0x38   :  { %227 = vmatpush.msra.mxu1 %v129_v2  ;;  %v123_v8 = vld [vmem:[#allocation10 + $0x48] sm:$0xff]  ;;  %v122_v9 = vld [vmem:[#allocation10 + $0x40] sm:$0xff]  ;;  %v121_v10 = vld [vmem:[#allocation10 + $0x38] sm:$0xff]  ;;  %v156_v21 = vshrl.u32 %v155_v20, 7  ;;  %455 = vset.pattern.permute.xlu1 %v586_v31 }
  0x39   :  { %v120_v11 = vld [vmem:[#allocation10 + $0x30] sm:$0xff]  ;;  %v119_v12 = vld [vmem:[#allocation10 + $0x28] sm:$0xff]  ;;  %v118_v13 = vld [vmem:[#allocation10 + $0x20] sm:$0xff]  ;;  %456 = vset.pattern.permute.xlu2 %v586_v31  ;;  %457 = vset.pattern.permute.xlu0 %v586_v31 }
  0x3a   :  { %228 = vmatpush.msra.mxu1 %v128_v3  ;;  %v117_v14 = vld [vmem:[#allocation10 + $0x18] sm:$0xff]  ;;  %v116_v15 = vld [vmem:[#allocation10 + $0x10] sm:$0xff]  ;;  %v115_v16 = vld [vmem:[#allocation10 + $0x8] sm:$0xff]  ;;  %v160_v23 = vadd.s32 %v159_v22, %v156_v21  ;;  %v157_v25 = vadd.s32 8, %v156_v21 }
  0x3b   :  { %133 = vmatpush.xpose.msra.mxu0 %v128_v3  ;;  %414 = vmatpush.xpose.msra.mxu2 %v128_v3  ;;  %v114_v17 = vld [vmem:[#allocation10] sm:$0xff]  ;;  %v131_v19 = vld [vmem:[#allocation13 + $0x8] sm:$0xff]  ;;  %v458_v24 = vld [vmem:[%s95_s21] ss:$0 sm:$0xff] }
  0x3c   :  { %229 = vmatpush.msra.mxu1 %v127_v4  ;;  %v130_v18 = vld [vmem:[#allocation13] sm:$0xff]  ;;  %vm164_vm1 = vcmp.eq.s32.totalorder %v160_v23, %v458_v24  ;;  %v161_v27 = vadd.s32 %v159_v22, %v157_v25  ;;  %v168_v32 = vld [vmem:[#allocation2] sm:$0xff]  ;;  %v169_v37 = vld [vmem:[#allocation2 + $0x8] sm:$0xff] }
  0x3d   :  { %v200_v54 = vld [vmem:[#allocation3] sm:$0xff]  ;;  %v201_v59 = vld [vmem:[#allocation3 + $0x8] sm:$0xff]  ;;  %v213_v60 = vld [vmem:[#allocation4] sm:$0xff]  ;;  %p405_p12 = scmp.ne.s32.totalorder %s256_s1, 1 }
  0x3e   :  { %230 = vmatpush.msra.mxu1 %v126_v5  ;;  %vm165_vm2 = vcmp.eq.s32.totalorder %v161_v27, %v458_v24  ;;  %v214_v3 = vld [vmem:[#allocation4 + $0x8] sm:$0xff] }
  0x3f   :  { %134 = vmatpush.xpose.msra.mxu0 %v127_v4  ;;  %415 = vmatpush.xpose.msra.mxu2 %v127_v4 }
  0x40   :  { %231 = vmatpush.msra.mxu1 %v125_v6 }
  0x42   :  { %232 = vmatpush.msra.mxu1 %v124_v7 }
  0x43   :  { %135 = vmatpush.xpose.msra.mxu0 %v126_v5  ;;  %416 = vmatpush.xpose.msra.mxu2 %v126_v5 }
  0x44   :  { %233 = vmatpush.msra.mxu1 %v123_v8 }
  0x46   :  { %234 = vmatpush.msra.mxu1 %v122_v9 }
  0x47   :  { %136 = vmatpush.xpose.msra.mxu0 %v125_v6  ;;  %417 = vmatpush.xpose.msra.mxu2 %v125_v6 }
  0x48   :  { %235 = vmatpush.msra.mxu1 %v121_v10 }
  0x4a   :  { %236 = vmatpush.msra.mxu1 %v120_v11 }
  0x4b   :  { %137 = vmatpush.xpose.msra.mxu0 %v124_v7  ;;  %418 = vmatpush.xpose.msra.mxu2 %v124_v7 }
  0x4c   :  { %237 = vmatpush.msra.mxu1 %v119_v12 }
  0x4e   :  { %238 = vmatpush.msra.mxu1 %v118_v13 }
  0x4f   :  { %138 = vmatpush.xpose.msra.mxu0 %v123_v8  ;;  %419 = vmatpush.xpose.msra.mxu2 %v123_v8 }
  0x50   :  { %239 = vmatpush.msra.mxu1 %v117_v14 }
  0x52   :  { %240 = vmatpush.msra.mxu1 %v116_v15 }
  0x53   :  { %139 = vmatpush.xpose.msra.mxu0 %v122_v9  ;;  %420 = vmatpush.xpose.msra.mxu2 %v122_v9 }
  0x54   :  { %241 = vmatpush.msra.mxu1 %v115_v16 }
  0x56   :  { %242 = vmatpush.msra.mxu1 %v114_v17 }
  0x57   :  { %140 = vmatpush.xpose.msra.mxu0 %v121_v10  ;;  %421 = vmatpush.xpose.msra.mxu2 %v121_v10 }
  0x5b   :  { %141 = vmatpush.xpose.msra.mxu0 %v120_v11  ;;  %422 = vmatpush.xpose.msra.mxu2 %v120_v11 }
  0x5f   :  { %142 = vmatpush.xpose.msra.mxu0 %v119_v12  ;;  %423 = vmatpush.xpose.msra.mxu2 %v119_v12 }
  0x63   :  { %143 = vmatpush.xpose.msra.mxu0 %v118_v13  ;;  %424 = vmatpush.xpose.msra.mxu2 %v118_v13 }
  0x67   :  { %144 = vmatpush.xpose.msra.mxu0 %v117_v14  ;;  %425 = vmatpush.xpose.msra.mxu2 %v117_v14 }
  0x6b   :  { %145 = vmatpush.xpose.msra.mxu0 %v116_v15  ;;  %426 = vmatpush.xpose.msra.mxu2 %v116_v15 }
  0x6f   :  { %146 = vmatpush.xpose.msra.mxu0 %v115_v16  ;;  %427 = vmatpush.xpose.msra.mxu2 %v115_v16 }
  0x73   :  { %147 = vmatpush.xpose.msra.mxu0 %v114_v17  ;;  %428 = vmatpush.xpose.msra.mxu2 %v114_v17 }
  0x76   :  { %148 = vmatmul.f32.vlgmr.msra.gmra.mxu0 %v130_v18  ;;  %151 = vmatmul.f32.vlgmr.msra.gmra.mxu2 %v131_v19 }
  0xf3   :  { %v149_v26 = vpop.f32.mrf.mxu0 }
  0xf4   :  { %v166_v28 = vsel %vm164_vm1, %v149_v26, -1e+30 }
  0xf5   :  { %170 = vmax.xlane.f32.xlu0 %v166_v28 }
  0xf9   :  { %v152_v29 = vpop.f32.mrf.mxu2 }
  0xfa   :  { %v167_v30 = vsel %vm165_vm2, %v152_v29, -1e+30 }
  0xfd   :  { %172 = vmax.xlane.f32.xlu0 %v167_v30 }
 0x168   :  { %v171_v33 = vpop.xlane.xlu0 %170 }
 0x169   :  { %v174_v34 = vmax.f32 %v168_v32, %v171_v33 }
 0x16b   :  { %v176_v35 = vsub.f32 %v168_v32, %v174_v34  ;;  %254 = vst.msk [vmem:[#allocation2] sm:$0xff] %vm210_vm3, %v174_v34  ;;  %184 = vperm.xlu1 %455, %v174_v34  }
 0x16d   :  { %v178_v36 = vmul.f32 1.442695, %v176_v35 }
 0x16f   :  { %459 = vpow2.f32 %v178_v36 }
 0x170   :  { %v173_v38 = vpop.xlane.xlu0 %172 }
 0x171   :  { %v175_v39 = vmax.f32 %v169_v37, %v173_v38 }
 0x173   :  { %v177_v40 = vsub.f32 %v169_v37, %v175_v39  ;;  %255 = vst.msk [vmem:[#allocation2 + $0x8] sm:$0xff] %vm210_vm3, %v175_v39  ;;  %189 = vperm.xlu1 %455, %v175_v39  }
 0x175   :  { %v460_v41 = vpop.eup %459  ;;  %v180_v42 = vmul.f32 1.442695, %v177_v40 }
 0x176   :  { %217 = vperm.xlu2 %456, %v460_v41   ;;  %v202_v55 = vmul.f32 %v460_v41, %v200_v54 }
 0x177   :  { %461 = vpow2.f32 %v180_v42 }
 0x17d   :  { %v462_v43 = vpop.eup %461 }
 0x17e   :  { %222 = vperm.xlu2 %456, %v462_v43   ;;  %v203_v61 = vmul.f32 %v462_v43, %v201_v59 }
 0x1d0   :  { %v218_v58 = vpop.permute.xlu2 %217 }
 0x1d1   :  { %v225_v62 = vmul.f32 %v218_v58, %v213_v60 }
 0x1d8   :  { %v223_v4 = vpop.permute.xlu2 %222 }
 0x1d9   :  { %v226_v5 = vmul.f32 %v223_v4, %v214_v3 }
 0x1dd   :  { %v185_v44 = vpop.permute.xlu1 %184 }
 0x1de   :  { %v192_v45 = vsub.f32 %v166_v28, %v185_v44 }
 0x1e0   :  { %v194_v46 = vmul.f32 1.442695, %v192_v45 }
 0x1e2   :  { %463 = vpow2.f32 %v194_v46 }
 0x1e5   :  { %v190_v47 = vpop.permute.xlu1 %189 }
 0x1e6   :  { %v193_v48 = vsub.f32 %v167_v30, %v190_v47 }
 0x1e8   :  { %v464_v49 = vpop.eup %463  ;;  %v196_v50 = vmul.f32 1.442695, %v193_v48 }
 0x1e9   :  { %403 = vmatmul.msk.f32.vlgmr.msra.gmra.mxu1 %vm164_vm1, %v464_v49  ;;  %v198_v51 = vsel %vm164_vm1, %v464_v49, 0.0 }
 0x1ea   :  { %465 = vpow2.f32 %v196_v50  ;;  %204 = vadd.xlane.f32.xlu0 %v198_v51 }
 0x1f0   :  { %v466_v52 = vpop.eup %465 }
 0x1f1   :  { %404 = vmatmul.msk.f32.gmra.mxu1 %vm165_vm2, %v466_v52  ;;  %v199_v53 = vsel %vm165_vm2, %v466_v52, 0.0 }
 0x1f2   :  { %206 = vadd.xlane.f32.xlu1 %v199_v53 }
 0x25d   :  { %v205_v56 = vpop.xlane.xlu0 %204 }
 0x25e   :  { %v208_v57 = vadd.f32 %v205_v56, %v202_v55 }
 0x260   :  { %211 = vst.msk [vmem:[#allocation3] sm:$0xff] %vm210_vm3, %v208_v57 }
 0x265   :  { %v207_v63 = vpop.xlane.xlu1 %206 }
 0x266   :  { %v209_v0 = vadd.f32 %v207_v63, %v203_v61  ;;  %v244_v1 = vpop.f32.mrf.mxu1 }
 0x267   :  { %v250_v2 = vadd.f32 %v244_v1, %v225_v62 }
 0x268   :  { %212 = vst.msk [vmem:[#allocation3 + $0x8] sm:$0xff] %vm210_vm3, %v209_v0 }
 0x269   :  { %252 = vst [vmem:[#allocation4] sm:$0xff] %v250_v2 }
 0x26d   :  { %260 = sbr.rel (%p405_p12) target bundleno = 905 (0x389), region = 37 }
 0x26e   :  { %v247_v6 = vpop.f32.mrf.mxu1 }
 0x26f   :  { %v251_v7 = vadd.f32 %v247_v6, %v226_v5 }
 0x271   :  { %253 = vst [vmem:[#allocation4 + $0x8] sm:$0xff] %v251_v7 }
 0x272   :  { %v261_v8 = vld [vmem:[#allocation3] sm:$0xff]  ;;  %v262_v9 = vld [vmem:[#allocation3 + $0x8] sm:$0xff]  ;;  %v587_v11 = vmov 0   ;;  %v334_v16 = vld [vmem:[#allocation15 + $0x68] sm:$0xff] }
 0x273   :  { %v336_v10 = vld [vmem:[#allocation15 + $0x78] sm:$0xff]  ;;  %468 = vset.pattern.permute.xlu1 %v587_v11  ;;  %vm293_vm4 = vcmp.gt.f32.partialorder %v261_v8, 0.0  ;;  %v263_v12 = vmax.f32 %v261_v8, 1e-30  ;;  %467 = vset.pattern.permute.xlu0 %v587_v11  ;;  %v726_v13 = vmax.f32 %v262_v9, 1e-30 }
 0x274   :  { %v309_v14 = vsel %vm293_vm4, 1, %v587_v11  ;;  %337 = vmatpush.msra.mxu0 %v336_v10  ;;  %v335_v15 = vld [vmem:[#allocation15 + $0x70] sm:$0xff]  ;;  %429 = vmatpush.msra.mxu1 %v336_v10  ;;  %vm294_vm5 = vcmp.gt.f32.partialorder %v262_v9, 0.0  ;;  %v333_v17 = vld [vmem:[#allocation15 + $0x60] sm:$0xff]  ;;  %v332_v18 = vld [vmem:[#allocation15 + $0x58] sm:$0xff] }
 0x275   :  { %312 = vperm.xlu1 %468, %v309_v14   ;;  %469 = vrcp.f32 %v263_v12  ;;  %v310_v19 = vsel %vm294_vm5, 1, %v587_v11  ;;  %v331_v21 = vld [vmem:[#allocation15 + $0x50] sm:$0xff]  ;;  %v276_v24 = vand.u32 2147483648, %v263_v12  ;;  %v330_v26 = vld [vmem:[#allocation15 + $0x48] sm:$0xff]  ;;  %vm270_vm6 = vweird.f32 %v263_v12  ;;  %v329_v30 = vld [vmem:[#allocation15 + $0x40] sm:$0xff] }
 0x276   :  { %471 = vrcp.f32 %v726_v13  ;;  %338 = vmatpush.msra.mxu0 %v335_v15  ;;  %430 = vmatpush.msra.mxu1 %v335_v15  ;;  %v274_v28 = vand.u32 2147483647, %v263_v12  ;;  %v328_v35 = vld [vmem:[#allocation15 + $0x38] sm:$0xff]  ;;  %vm284_vm10 = vweird.f32 %v726_v13  ;;  %v290_v37 = vand.u32 2147483648, %v726_v13  ;;  %v327_v38 = vld [vmem:[#allocation15 + $0x30] sm:$0xff]  ;;  %v326_v43 = vld [vmem:[#allocation15 + $0x28] sm:$0xff] }
 0x277   :  { %v277_v33 = vor.u32 1.1754944e-38, %v276_v24  ;;  %v288_v41 = vand.u32 2147483647, %v726_v13  ;;  %v325_v47 = vld [vmem:[#allocation15 + $0x20] sm:$0xff]  ;;  %v324_v48 = vld [vmem:[#allocation15 + $0x18] sm:$0xff]  ;;  %v323_v49 = vld [vmem:[#allocation15 + $0x10] sm:$0xff] }
 0x278   :  { %339 = vmatpush.msra.mxu0 %v334_v16  ;;  %431 = vmatpush.msra.mxu1 %v334_v16  ;;  %vm275_vm9 = vcmp.eq.f32.partialorder %v274_v28, 8.507059e+37  ;;  %v291_v44 = vor.u32 1.1754944e-38, %v290_v37  ;;  %v322_v50 = vld [vmem:[#allocation15 + $0x8] sm:$0xff]  ;;  %v321_v51 = vld [vmem:[#allocation15] sm:$0xff] }
 0x279   :  { %vm289_vm13 = vcmp.eq.f32.partialorder %v288_v41, 8.507059e+37  ;;  %v295_v53 = vld [vmem:[#allocation4] sm:$0xff]  ;;  %v296_v56 = vld [vmem:[#allocation4 + $0x8] sm:$0xff] }
 0x27a   :  { %340 = vmatpush.msra.mxu0 %v333_v17  ;;  %432 = vmatpush.msra.mxu1 %v333_v17 }
 0x27b   :  { %v470_v20 = vpop.eup %469 }
 0x27c   :  { %v472_v22 = vpop.eup %471  ;;  %v266_v23 = vmul.f32 %v470_v20, %v263_v12  ;;  %341 = vmatpush.msra.mxu0 %v332_v18  ;;  %433 = vmatpush.msra.mxu1 %v332_v18  ;;  %vm271_vm7 = vweird.f32 %v470_v20 }
 0x27d   :  { %315 = vperm.xlu1 %468, %v310_v19   ;;  %v280_v25 = vmul.f32 %v472_v22, %v726_v13  ;;  %vm730_vm8 = vmor %vm270_vm6, %vm271_vm7  ;;  %vm285_vm11 = vweird.f32 %v472_v22 }
 0x27e   :  { %v267_v27 = vsub.f32 1.0, %v266_v23  ;;  %342 = vmatpush.msra.mxu0 %v331_v21  ;;  %434 = vmatpush.msra.mxu1 %v331_v21  ;;  %vm286_vm12 = vmor %vm284_vm10, %vm285_vm11 }
 0x27f   :  { %v281_v29 = vsub.f32 1.0, %v280_v25 }
 0x280   :  { %v268_v31 = vmul.f32 %v470_v20, %v267_v27  ;;  %343 = vmatpush.msra.mxu0 %v330_v26  ;;  %435 = vmatpush.msra.mxu1 %v330_v26 }
 0x281   :  { %v282_v34 = vmul.f32 %v472_v22, %v281_v29 }
 0x282   :  { %v269_v36 = vadd.f32 %v470_v20, %v268_v31  ;;  %344 = vmatpush.msra.mxu0 %v329_v30  ;;  %436 = vmatpush.msra.mxu1 %v329_v30 }
 0x283   :  { %v283_v40 = vadd.f32 %v472_v22, %v282_v34 }
 0x284   :  { %v273_v39 = vsel %vm730_vm8, %v470_v20, %v269_v36  ;;  %345 = vmatpush.msra.mxu0 %v328_v35  ;;  %437 = vmatpush.msra.mxu1 %v328_v35 }
 0x285   :  { %v278_v42 = vsel %vm275_vm9, %v277_v33, %v273_v39  ;;  %v287_v45 = vsel %vm286_vm12, %v472_v22, %v283_v40 }
 0x286   :  { %299 = vperm.xlu0 %467, %v278_v42   ;;  %346 = vmatpush.msra.mxu0 %v327_v38  ;;  %v292_v46 = vsel %vm289_vm13, %v291_v44, %v287_v45 }
 0x287   :  { %438 = vmatpush.msra.mxu1 %v327_v38 }
 0x288   :  { %347 = vmatpush.msra.mxu0 %v326_v43 }
 0x289   :  { %439 = vmatpush.msra.mxu1 %v326_v43 }
 0x28a   :  { %348 = vmatpush.msra.mxu0 %v325_v47 }
 0x28b   :  { %440 = vmatpush.msra.mxu1 %v325_v47 }
 0x28c   :  { %349 = vmatpush.msra.mxu0 %v324_v48 }
 0x28d   :  { %441 = vmatpush.msra.mxu1 %v324_v48 }
 0x28e   :  { %304 = vperm.xlu0 %467, %v292_v46   ;;  %350 = vmatpush.msra.mxu0 %v323_v49 }
 0x28f   :  { %442 = vmatpush.msra.mxu1 %v323_v49 }
 0x290   :  { %351 = vmatpush.msra.mxu0 %v322_v50 }
 0x291   :  { %443 = vmatpush.msra.mxu1 %v322_v50 }
 0x292   :  { %352 = vmatpush.msra.mxu0 %v321_v51 }
 0x293   :  { %444 = vmatpush.msra.mxu1 %v321_v51 }
 0x2e7   :  { %v313_v52 = vpop.permute.xlu1 %312 }
 0x2e8   :  { %vm317_vm14 = vcmp.eq.s32.totalorder %v313_v52, 1 }
 0x2ef   :  { %v316_v57 = vpop.permute.xlu1 %315 }
 0x2f0   :  { %vm318_vm15 = vcmp.eq.s32.totalorder %v316_v57, 1 }
 0x2f8   :  { %v300_v54 = vpop.permute.xlu0 %299 }
 0x2f9   :  { %v307_v55 = vmul.f32 %v300_v54, %v295_v53 }
 0x2fb   :  { %406 = vmatmul.msk.f32.vlgmr.msra.gmra.mxu0 %vm317_vm14, %v307_v55 }
 0x300   :  { %v305_v58 = vpop.permute.xlu0 %304 }
 0x301   :  { %v308_v59 = vmul.f32 %v305_v58, %v296_v56 }
 0x303   :  { %407 = vmatmul.msk.f32.vlgmr.msra.gmra.mxu1 %vm318_vm15, %v308_v59 }
 0x378   :  { %v354_v60 = vpop.f32.mrf.mxu0 }
 0x379   :  { %473 = vtanh.f32 %v354_v60 }
 0x37f   :  { %v474_v61 = vpop.eup %473 }
 0x380   :  { %362 = vst [vmem:[#allocation16] sm:$0xff] %v474_v61  ;;  %v357_v62 = vpop.f32.mrf.mxu1 }
 0x381   :  { %475 = vtanh.f32 %v357_v62 }
 0x387   :  { %v476_v63 = vpop.eup %475 }
 0x388   :  { %363 = vst [vmem:[#allocation16 + $0x8] sm:$0xff] %v476_v63 }
 0x389 PF:  { %s366_s5 = sld [smem:[#allocation6]]  ;;  %s588_s30 = smov [#allocation16]  }
 0x38a   :  { %s372_s10 = sshll.u32 %s588_s30, 4  ;;  %s565_s20 = scalar_lea.hbm %s759_s8, 16  ;;  %s373_s10 = int_to_ptr.vmem [resolvable:$true] %s372_s10 }
 0x38f   :  { %s412_s7 = sshll.u32 %s366_s5, 4 }
 0x390   :  { %s371_s13 = scalar_lea.hbm %s759_s8, %s412_s7 }
 0x391   :  { %s374_s16 = sshll.u32 %s371_s13, 4  ;;  %s375_s16 = int_to_ptr.hbm [resolvable:$true] %s374_s16 }
 0x392   :  { %s561_s0 = sshra.s32 %s375_s16, 4  ;;  %s562_s0 = int_to_ptr.hbm [resolvable:$true] %s561_s0 }
 0x393   :  { %s563_s3 = scalar_lea.hbm %s562_s0, 16  ;;  %p566_p0 = scmp.lt.s32.totalorder %s562_s0, %s759_s8 }
 0x394   :  { %p564_p13 = scmp.ne.s32.totalorder %s562_s0, %s563_s3  ;;  %p567_p1 = scmp.lt.s32.totalorder %s565_s20, %s563_s3 }
 0x396   :  { %p568_p2 = por %p567_p1, %p566_p0 }
 0x398   :  { %p569_p3 = pnand %p568_p2, %p564_p13 }
 0x39a   :  { %572 = shalt.err (!%p569_p3)
}
 0x39b   :  { %380 = dma.vmem_to_hbm [thread:$0]  %s373_s10, 256, %s375_s16, [#allocation12], %s582_s14, %s582_s14, %s583_s15  }
 0x39c   :  { %577 = dma.done.wait [#allocation12], 256  }
 0x39d   :  { %578 = vsyncadd [#allocation12], 4294967040 }
 0x39e   :  { %385 = vsyncpa [#allocation11], 1 }
 0x39f   :  { %386 = vsyncpa [#allocation14], 1 }
 0x3a0   :  { %387 = vsyncpa [#allocation12], 1 }

</bundles_post_ra>
